<compile_context>
chip_gen: v7x
topology: tpu7x:2x2x1
jax: 0.10.0
libtpu: 0.0.40
codegen_flags: <defaults>
</compile_context>

<pallas_src>
import functools

import jax
import jax.numpy as jnp
import numpy as np
from jax.experimental import pallas as pl
from jax.experimental.pallas import tpu as pltpu

LN_EPS = 1e-5
_LANE = 128


def _round_up(v, m):
    return (v + m - 1) // m * m


def _ffn_kernel(x_ref, gamma_ref, beta_ref, w1_ref, b1_ref, w2_ref, b2_ref, o_ref,
                *, d_real):
    """Fused LayerNorm -> Linear -> SiLU -> Linear on one row tile.

    x_ref:  (tm, Dp)  input rows (zero-padded rows / lanes allowed)
    w1_ref: (Dp, Hp)  bf16, pre-transposed to (in, out), zero in padded rows/cols
    w2_ref: (Hp, Dp)  bf16, pre-transposed to (in, out), zero in padded rows/cols
    gamma/beta/b1/b2: f32 row vectors, zero in padded lanes
    d_real: true (unpadded) feature width for the LayerNorm statistics
    """
    x = x_ref[...].astype(jnp.float32)                        # (tm, Dp)
    inv_d = jnp.float32(1.0 / d_real)

    # LayerNorm over the real D lanes (padded lanes hold zeros in x).
    mean = jnp.sum(x, axis=-1, keepdims=True) * inv_d
    centered = x - mean
    if d_real != x.shape[-1]:
        col = jax.lax.broadcasted_iota(jnp.int32, x.shape, 1)
        centered = jnp.where(col < d_real, centered, 0.0)
    var = jnp.sum(centered * centered, axis=-1, keepdims=True) * inv_d
    xn = centered * jax.lax.rsqrt(var + LN_EPS) * gamma_ref[...] + beta_ref[...]

    # ff1 + SiLU: bf16 operands into the MXU, f32 accumulation, f32 elementwise.
    h = jnp.dot(xn.astype(jnp.bfloat16), w1_ref[...],
                preferred_element_type=jnp.float32) + b1_ref[...]
    h = h * jax.nn.sigmoid(h)                                 # SiLU  (tm, Hp)

    # dropout p=0.0 -> identity

    # ff2 (padded Hp rows of W2 are zero; padded Dp output lanes come out zero).
    y = jnp.dot(h.astype(jnp.bfloat16), w2_ref[...],
                preferred_element_type=jnp.float32) + b2_ref[...]

    # dropout p=0.0 -> identity
    o_ref[...] = y.astype(o_ref.dtype)                        # (tm, Dp)


def prepare_ffn_params(params):
    """One-time glue per switch index: slice to the active width (exactly as
    SlimmableLinear / SwitchableLayerNorm do), transpose weights to (in, out),
    cast MXU operands to bf16 and zero-pad feature/hidden dims to multiples of
    128 lanes.  Runs once at init so no transpose / cast / pad is in the
    per-call hot path."""
    prepared = {}
    for idx, s in enumerate(params["switches"]):
        d = int(s * params["input_dim"])
        h = int(s * params["hidden_dim"])
        d_pad = _round_up(d, _LANE)
        h_pad = _round_up(h, _LANE)

        gamma = jnp.pad(params["ln_weight"][idx][:d].astype(jnp.float32),
                        (0, d_pad - d)).reshape(1, d_pad)
        beta = jnp.pad(params["ln_bias"][idx][:d].astype(jnp.float32),
                       (0, d_pad - d)).reshape(1, d_pad)
        # torch Linear weight layout is (out, in); transpose once to (in, out).
        w1 = jnp.pad(params["ff1_weight"][:h, :d].T.astype(jnp.bfloat16),
                     ((0, d_pad - d), (0, h_pad - h)))
        b1 = jnp.pad(params["ff1_bias"][:h].astype(jnp.float32),
                     (0, h_pad - h)).reshape(1, h_pad)
        w2 = jnp.pad(params["ff2_weight"][:d, :h].T.astype(jnp.bfloat16),
                     ((0, h_pad - h), (0, d_pad - d)))
        b2 = jnp.pad(params["ff2_bias"][:d].astype(jnp.float32),
                     (0, d_pad - d)).reshape(1, d_pad)

        prepared[idx] = dict(d=d, h=h, d_pad=d_pad, h_pad=h_pad,
                             gamma=gamma, beta=beta, w1=w1, b1=b1, w2=w2, b2=b2)
    return prepared


def feed_forward_module(x, prepared, idx, *, tile_m=256):
    """Apply the slimmable FFN at switch index `idx` (static Python int).

    x: (..., D_idx) at the slimmed width.
    prepared: output of prepare_ffn_params(params).
    tile_m: row tile; 256 for v6e/v7x, 128 is a good choice on v5e.
    """
    p = prepared[idx]
    d, h, d_pad, h_pad = p["d"], p["h"], p["d_pad"], p["h_pad"]
    assert x.shape[-1] == d, f"expected last dim {d}, got {x.shape[-1]}"

    orig_shape = x.shape
    n = int(np.prod(orig_shape[:-1]))
    x2 = x.reshape(n, d)

    # Clamp the tile to the (padded) row count, keep it a multiple of 8 sublanes.
    tm = max(8, min(int(tile_m), _round_up(n, 8)))
    n_pad = _round_up(n, tm)
    if (n_pad != n) or (d_pad != d):
        x2 = jnp.pad(x2, ((0, n_pad - n), (0, d_pad - d)))

    grid = (n_pad // tm,)

    # Explicit VMEM budget: bf16 weights (double-buffered by Pallas), double-buffered
    # x/out tiles, f32 intermediates.  Capped at 56 MiB so it is valid on v7x too.
    itemsize = jnp.dtype(x.dtype).itemsize
    weight_bytes = (d_pad * h_pad + h_pad * d_pad) * 2          # bf16, per copy
    io_bytes = 2 * 2 * tm * d_pad * itemsize                    # x + out, 2 buffers each
    vec_bytes = 2 * (3 * d_pad + h_pad) * 4
    interm_bytes = tm * h_pad * 4 + 2 * tm * d_pad * 4          # f32 temporaries
    est = 2 * weight_bytes + io_bytes + vec_bytes + interm_bytes
    vmem_limit = int(min(max(est * 3 // 2, 32 * 1024 * 1024), 56 * 1024 * 1024))

    out = pl.pallas_call(
        functools.partial(_ffn_kernel, d_real=d),
        out_shape=jax.ShapeDtypeStruct((n_pad, d_pad), x.dtype),
        grid_spec=pltpu.PrefetchScalarGridSpec(
            num_scalar_prefetch=0,
            grid=grid,
            in_specs=[
                pl.BlockSpec((tm, d_pad), lambda i: (i, 0)),     # x rows
                pl.BlockSpec((1, d_pad), lambda i: (0, 0)),      # gamma
                pl.BlockSpec((1, d_pad), lambda i: (0, 0)),      # beta
                pl.BlockSpec((d_pad, h_pad), lambda i: (0, 0)),  # W1 (in, out) bf16
                pl.BlockSpec((1, h_pad), lambda i: (0, 0)),      # b1
                pl.BlockSpec((h_pad, d_pad), lambda i: (0, 0)),  # W2 (in, out) bf16
                pl.BlockSpec((1, d_pad), lambda i: (0, 0)),      # b2
            ],
            out_specs=pl.BlockSpec((tm, d_pad), lambda i: (i, 0)),
        ),
        compiler_params=pltpu.CompilerParams(
            dimension_semantics=("parallel",),
            vmem_limit_bytes=vmem_limit,
        ),
    )(x2, p["gamma"], p["beta"], p["w1"], p["b1"], p["w2"], p["b2"])

    if (n_pad != n) or (d_pad != d):
        out = out[:n, :d]
    return out.reshape(orig_shape)


def _reference(x, params, idx):
    """Pure-JAX reference mirroring the kernel's dtype strategy
    (f32 LN/elementwise, bf16 MXU operands, f32 accumulation)."""
    switches = params["switches"]
    d = int(switches[idx] * params["input_dim"])
    h = int(switches[idx] * params["hidden_dim"])
    gamma = params["ln_weight"][idx][:d].astype(jnp.float32)
    beta = params["ln_bias"][idx][:d].astype(jnp.float32)
    w1 = params["ff1_weight"][:h, :d].astype(jnp.bfloat16)
    b1 = params["ff1_bias"][:h].astype(jnp.float32)
    w2 = params["ff2_weight"][:d, :h].astype(jnp.bfloat16)
    b2 = params["ff2_bias"][:d].astype(jnp.float32)

    xf = x.astype(jnp.float32)
    mean = jnp.mean(xf, axis=-1, keepdims=True)
    var = jnp.mean((xf - mean) ** 2, axis=-1, keepdims=True)
    xn = (xf - mean) * jax.lax.rsqrt(var + LN_EPS) * gamma + beta
    hh = jnp.dot(xn.astype(jnp.bfloat16), w1.T,
                 preferred_element_type=jnp.float32) + b1
    hh = hh * jax.nn.sigmoid(hh)
    y = jnp.dot(hh.astype(jnp.bfloat16), w2.T,
                preferred_element_type=jnp.float32) + b2
    return y.astype(x.dtype)


def make_params(key, input_dim, hidden_dim, switches=(0.75, 1.0)):
    """Deterministic synthetic full-width parameters (sliced per switch index)."""
    keys = jax.random.split(key, 6)
    full_in, full_h = input_dim, hidden_dim
    ln_weight, ln_bias = [], []
    for i, s in enumerate(switches):
        d_i = int(s * input_dim)
        ln_weight.append(1.0 + 0.01 * jax.random.normal(jax.random.fold_in(keys[0], i), (d_i,)))
        ln_bias.append(0.01 * jax.random.normal(jax.random.fold_in(keys[1], i), (d_i,)))
    return {
        "switches": tuple(switches),
        "input_dim": input_dim,
        "hidden_dim": hidden_dim,
        "ln_weight": ln_weight,
        "ln_bias": ln_bias,
        # torch Linear weight layout: (out_features, in_features)
        "ff1_weight": jax.random.normal(keys[2], (full_h, full_in)) * 0.05,
        "ff1_bias": jax.random.normal(keys[3], (full_h,)) * 0.05,
        "ff2_weight": jax.random.normal(keys[4], (full_in, full_h)) * 0.05,
        "ff2_bias": jax.random.normal(keys[5], (full_in,)) * 0.05,
    }


if __name__ == "__main__":
    key = jax.random.PRNGKey(0)
    k_param, k_x0, k_x1 = jax.random.split(key, 3)

    input_dim, hidden_dim = 32, 64
    switches = (0.75, 1.0)
    params = make_params(k_param, input_dim, hidden_dim, switches)
    prepared = prepare_ffn_params(params)   # one-time transpose / cast / pad

    batch, seq = 2, 8  # 16 rows

    ok = True
    for idx, kx in ((0, k_x0), (1, k_x1)):
        d = int(switches[idx] * input_dim)
        x = jax.random.normal(kx, (batch, seq, d), dtype=jnp.float32)
        y = feed_forward_module(x, prepared, idx)
        y = jax.block_until_ready(y)
        y_ref = _reference(x, params, idx)
        if not np.allclose(np.asarray(y), np.asarray(y_ref), atol=2e-3, rtol=2e-3):
            ok = False

    print("KERNEL_OK" if ok else "KERNEL_MISMATCH")
</pallas_src>

<mosaic_0001>
module attributes {stable_mosaic.version = 11 : i64} {
  func.func @_ffn_kernel(%arg0: i32, %arg1: memref<16x128xf32, #tpu.memory_space<vmem>>, %arg2: memref<1x128xf32, #tpu.memory_space<vmem>>, %arg3: memref<1x128xf32, #tpu.memory_space<vmem>>, %arg4: memref<128x128xbf16, #tpu.memory_space<vmem>>, %arg5: memref<1x128xf32, #tpu.memory_space<vmem>>, %arg6: memref<128x128xbf16, #tpu.memory_space<vmem>>, %arg7: memref<1x128xf32, #tpu.memory_space<vmem>>, %arg8: memref<16x128xf32, #tpu.memory_space<vmem>>) attributes {dimension_semantics = [#tpu.dimension_semantics<parallel>], iteration_bounds = array<i64: 1>, scalar_prefetch = 0 : i64, scratch_operands = 0 : i64, tpu.core_type = #tpu.core_type<tc>, window_params = [{transform_indices = @transform_0, window_bounds = array<i64: 16, 128>}, {pipeline_mode = #tpu.pipeline_mode<synchronous>, transform_indices = @transform_1, window_bounds = array<i64: 1, 128>}, {pipeline_mode = #tpu.pipeline_mode<synchronous>, transform_indices = @transform_2, window_bounds = array<i64: 1, 128>}, {pipeline_mode = #tpu.pipeline_mode<synchronous>, transform_indices = @transform_3, window_bounds = array<i64: 128, 128>}, {pipeline_mode = #tpu.pipeline_mode<synchronous>, transform_indices = @transform_4, window_bounds = array<i64: 1, 128>}, {pipeline_mode = #tpu.pipeline_mode<synchronous>, transform_indices = @transform_5, window_bounds = array<i64: 128, 128>}, {pipeline_mode = #tpu.pipeline_mode<synchronous>, transform_indices = @transform_6, window_bounds = array<i64: 1, 128>}, {transform_indices = @transform_7, window_bounds = array<i64: 16, 128>}]} {
    %c0 = arith.constant 0 : index
    %c0_0 = arith.constant 0 : index
    %0 = vector.load %arg1[%c0, %c0_0] : memref<16x128xf32, #tpu.memory_space<vmem>>, vector<16x128xf32>
    %cst = arith.constant dense<0.000000e+00> : vector<16xf32>
    %1 = vector.multi_reduction <add>, %0, %cst [1] : vector<16x128xf32> to vector<16xf32>
    %2 = vector.shape_cast %1 : vector<16xf32> to vector<16x1xf32>
    %cst_1 = arith.constant 0.0416666679 : f32
    %3 = vector.broadcast %cst_1 : f32 to vector<16x1xf32>
    %4 = arith.mulf %2, %3 : vector<16x1xf32>
    %5 = vector.broadcast %4 : vector<16x1xf32> to vector<16x128xf32>
    %6 = arith.subf %0, %5 : vector<16x128xf32>
    %7 = tpu.iota {dimensions = array<i32: 1>} : vector<16x128xi32>
    %c24_i32 = arith.constant 24 : i32
    %8 = vector.broadcast %c24_i32 : i32 to vector<16x128xi32>
    %9 = arith.cmpi slt, %7, %8 : vector<16x128xi32>
    %cst_2 = arith.constant 0.000000e+00 : f32
    %10 = vector.broadcast %cst_2 : f32 to vector<16x128xf32>
    %11 = arith.select %9, %6, %10 : vector<16x128xi1>, vector<16x128xf32>
    %12 = arith.mulf %11, %11 : vector<16x128xf32>
    %cst_3 = arith.constant dense<0.000000e+00> : vector<16xf32>
    %13 = vector.multi_reduction <add>, %12, %cst_3 [1] : vector<16x128xf32> to vector<16xf32>
    %14 = vector.shape_cast %13 : vector<16xf32> to vector<16x1xf32>
    %cst_4 = arith.constant 0.0416666679 : f32
    %15 = vector.broadcast %cst_4 : f32 to vector<16x1xf32>
    %16 = arith.mulf %14, %15 : vector<16x1xf32>
    %cst_5 = arith.constant 9.99999974E-6 : f32
    %17 = vector.broadcast %cst_5 : f32 to vector<16x1xf32>
    %18 = arith.addf %16, %17 : vector<16x1xf32>
    %19 = math.rsqrt %18 : vector<16x1xf32>
    %20 = vector.broadcast %19 : vector<16x1xf32> to vector<16x128xf32>
    %21 = arith.mulf %11, %20 : vector<16x128xf32>
    %c0_6 = arith.constant 0 : index
    %c0_7 = arith.constant 0 : index
    %22 = vector.load %arg2[%c0_6, %c0_7] : memref<1x128xf32, #tpu.memory_space<vmem>>, vector<1x128xf32>
    %23 = vector.broadcast %22 : vector<1x128xf32> to vector<16x128xf32>
    %24 = arith.mulf %21, %23 : vector<16x128xf32>
    %c0_8 = arith.constant 0 : index
    %c0_9 = arith.constant 0 : index
    %25 = vector.load %arg3[%c0_8, %c0_9] : memref<1x128xf32, #tpu.memory_space<vmem>>, vector<1x128xf32>
    %26 = vector.broadcast %25 : vector<1x128xf32> to vector<16x128xf32>
    %27 = arith.addf %24, %26 : vector<16x128xf32>
    %28 = arith.truncf %27 : vector<16x128xf32> to vector<16x128xbf16>
    %c0_10 = arith.constant 0 : index
    %c0_11 = arith.constant 0 : index
    %29 = vector.load %arg4[%c0_10, %c0_11] : memref<128x128xbf16, #tpu.memory_space<vmem>>, vector<128x128xbf16>
    %cst_12 = arith.constant dense<0.000000e+00> : vector<16x128xf32>
    %30 = tpu.matmul %28, %29, %cst_12 {dimension_numbers = #tpu.dot_dimension_numbers<[1], [0], [0], [1], [0, 0, 1, 1], [], []>} : vector<16x128xbf16>, vector<128x128xbf16>, vector<16x128xf32> -> vector<16x128xf32>
    %c0_13 = arith.constant 0 : index
    %c0_14 = arith.constant 0 : index
    %31 = vector.load %arg5[%c0_13, %c0_14] : memref<1x128xf32, #tpu.memory_space<vmem>>, vector<1x128xf32>
    %32 = vector.broadcast %31 : vector<1x128xf32> to vector<16x128xf32>
    %33 = arith.addf %30, %32 : vector<16x128xf32>
    %34 = arith.negf %33 : vector<16x128xf32>
    %35 = math.exp %34 : vector<16x128xf32>
    %cst_15 = arith.constant 1.000000e+00 : f32
    %36 = vector.broadcast %cst_15 : f32 to vector<16x128xf32>
    %37 = arith.addf %36, %35 : vector<16x128xf32>
    %38 = arith.divf %36, %37 : vector<16x128xf32>
    %39 = arith.mulf %33, %38 : vector<16x128xf32>
    %40 = arith.truncf %39 : vector<16x128xf32> to vector<16x128xbf16>
    %c0_16 = arith.constant 0 : index
    %c0_17 = arith.constant 0 : index
    %41 = vector.load %arg6[%c0_16, %c0_17] : memref<128x128xbf16, #tpu.memory_space<vmem>>, vector<128x128xbf16>
    %cst_18 = arith.constant dense<0.000000e+00> : vector<16x128xf32>
    %42 = tpu.matmul %40, %41, %cst_18 {dimension_numbers = #tpu.dot_dimension_numbers<[1], [0], [0], [1], [0, 0, 1, 1], [], []>} : vector<16x128xbf16>, vector<128x128xbf16>, vector<16x128xf32> -> vector<16x128xf32>
    %c0_19 = arith.constant 0 : index
    %c0_20 = arith.constant 0 : index
    %43 = vector.load %arg7[%c0_19, %c0_20] : memref<1x128xf32, #tpu.memory_space<vmem>>, vector<1x128xf32>
    %44 = vector.broadcast %43 : vector<1x128xf32> to vector<16x128xf32>
    %45 = arith.addf %42, %44 : vector<16x128xf32>
    %c0_21 = arith.constant 0 : index
    %c0_22 = arith.constant 0 : index
    %46 = vector.load %arg8[%c0_21, %c0_22] : memref<16x128xf32, #tpu.memory_space<vmem>>, vector<16x128xf32>
    tpu.vector_store %arg8[%c0_21, %c0_22], %45 {strides = array<i32>} : memref<16x128xf32, #tpu.memory_space<vmem>>, vector<16x128xf32>,
    return
  }
  func.func @transform_0(%arg0: i32) -> (i32, i32) {
    %c0_i32 = arith.constant 0 : i32
    %c0_i32_0 = arith.constant 0 : i32
    return %arg0, %c0_i32 : i32, i32
  }
  func.func @transform_1(%arg0: i32) -> (i32, i32) {
    %c0_i32 = arith.constant 0 : i32
    %c0_i32_0 = arith.constant 0 : i32
    %c0_i32_1 = arith.constant 0 : i32
    return %c0_i32, %c0_i32_0 : i32, i32
  }
  func.func @transform_2(%arg0: i32) -> (i32, i32) {
    %c0_i32 = arith.constant 0 : i32
    %c0_i32_0 = arith.constant 0 : i32
    %c0_i32_1 = arith.constant 0 : i32
    return %c0_i32, %c0_i32_0 : i32, i32
  }
  func.func @transform_3(%arg0: i32) -> (i32, i32) {
    %c0_i32 = arith.constant 0 : i32
    %c0_i32_0 = arith.constant 0 : i32
    %c0_i32_1 = arith.constant 0 : i32
    return %c0_i32, %c0_i32_0 : i32, i32
  }
  func.func @transform_4(%arg0: i32) -> (i32, i32) {
    %c0_i32 = arith.constant 0 : i32
    %c0_i32_0 = arith.constant 0 : i32
    %c0_i32_1 = arith.constant 0 : i32
    return %c0_i32, %c0_i32_0 : i32, i32
  }
  func.func @transform_5(%arg0: i32) -> (i32, i32) {
    %c0_i32 = arith.constant 0 : i32
    %c0_i32_0 = arith.constant 0 : i32
    %c0_i32_1 = arith.constant 0 : i32
    return %c0_i32, %c0_i32_0 : i32, i32
  }
  func.func @transform_6(%arg0: i32) -> (i32, i32) {
    %c0_i32 = arith.constant 0 : i32
    %c0_i32_0 = arith.constant 0 : i32
    %c0_i32_1 = arith.constant 0 : i32
    return %c0_i32, %c0_i32_0 : i32, i32
  }
  func.func @transform_7(%arg0: i32) -> (i32, i32) {
    %c0_i32 = arith.constant 0 : i32
    %c0_i32_0 = arith.constant 0 : i32
    return %arg0, %c0_i32 : i32, i32
  }
}

</mosaic_0001>

<bundles_post_ra>
// kernel: tpu_custom_call.1
= control target key start
LH: loop header
LB: loop body
LE: loop exit
PB: predicated region body
PF: predicated region fallthrough
CT: control target
= control target key end

     0   :  { %12 = vsyncpa [#allocation3], 0  ;;  %s728_s0 = inlined_call_operand.hbm [shape: f32[16,128], index: 0, kind: input, shape index: {}]   ;;  %s729_s1 = inlined_call_operand.vmem [shape: f32[1,128], index: 1, kind: input, shape index: {}]   ;;  %s730_s2 = inlined_call_operand.vmem [shape: f32[1,128], index: 2, kind: input, shape index: {}]   ;;  %s731_s3 = inlined_call_operand.hbm [shape: bf16[128,128], index: 3, kind: input, shape index: {}]   ;;  %s732_s4 = inlined_call_operand.vmem [shape: f32[1,128], index: 4, kind: input, shape index: {}]   ;;  %s733_s5 = inlined_call_operand.hbm [shape: bf16[128,128], index: 5, kind: input, shape index: {}]   ;;  %s734_s6 = inlined_call_operand.vmem [shape: f32[1,128], index: 6, kind: input, shape index: {}]   ;;  %s735_s7 = inlined_call_operand.hbm [shape: f32[16,128], index: 7, kind: output, shape index: {}]  }
   0x1   :  { %13 = vsyncpa [#allocation6], 0 }
   0x2   :  { %14 = vsyncpa [#allocation4], 0  ;;  %s588_s24 = smov [#allocation5]   ;;  %s494_s28 = scalar_lea.hbm %s731_s3, 1024 }
   0x3   :  { %s36_s25 = sshll.u32 %s588_s24, 4  ;;  %p495_p0 = scmp.ne.s32.totalorder %s731_s3, %s494_s28  ;;  %s37_s25 = int_to_ptr.vmem [resolvable:$true] %s36_s25 }
   0x4   :  { %p498_p1 = scmp.lt.u32.totalorder %s494_s28, %s731_s3 }
   0x6   :  { %p500_p2 = pnand %p498_p1, %p495_p0 }
   0x8   :  { %503 = shalt.err (!%p500_p2)
}
   0x9   :  { %s504_s10 = scalar_lea.vmem %s37_s25, 1024  ;;  %p509_p4 = scmp.lt.s32.totalorder %s37_s25, %s37_s25 }
   0xa   :  { %p505_p3 = scmp.ne.s32.totalorder %s37_s25, %s504_s10  ;;  %p510_p5 = scmp.lt.s32.totalorder %s504_s10, %s504_s10 }
   0xc   :  { %p511_p6 = por %p510_p5, %p509_p4 }
   0xe   :  { %p512_p7 = pnand %p511_p6, %p505_p3 }
  0x10   :  { %515 = shalt.err (!%p512_p7)
}
  0x11   :  { %s589_s11 = smov 64   ;;  %s590_s12 = smov 4  }
  0x12   :  { %42 = dma.hbm_to_vmem [thread:$0]  %s731_s3, 1024, %s37_s25, [#allocation6], %s589_s11, %s589_s11, %s590_s12  }
  0x13   :  { %s591_s15 = smov [#allocation2]   ;;  %s516_s19 = scalar_lea.hbm %s728_s0, 256 }
  0x14   :  { %s20_s16 = sshll.u32 %s591_s15, 4  ;;  %p517_p8 = scmp.ne.s32.totalorder %s728_s0, %s516_s19  ;;  %s21_s16 = int_to_ptr.vmem [resolvable:$true] %s20_s16 }
  0x15   :  { %p520_p9 = scmp.lt.u32.totalorder %s516_s19, %s728_s0 }
  0x17   :  { %p522_p10 = pnand %p520_p9, %p517_p8 }
  0x19   :  { %525 = shalt.err (!%p522_p10)
}
  0x1a   :  { %s526_s24 = scalar_lea.vmem %s21_s16, 256  ;;  %p531_p12 = scmp.lt.s32.totalorder %s21_s16, %s21_s16 }
  0x1b   :  { %p527_p11 = scmp.ne.s32.totalorder %s21_s16, %s526_s24  ;;  %p532_p13 = scmp.lt.s32.totalorder %s526_s24, %s526_s24 }
  0x1d   :  { %p533_p0 = por %p532_p13, %p531_p12 }
  0x1f   :  { %p534_p1 = pnand %p533_p0, %p527_p11 }
  0x21   :  { %537 = shalt.err (!%p534_p1)
}
  0x22   :  { %s592_s3 = smov 128   ;;  %s593_s25 = smov 8  }
  0x23   :  { %26 = dma.hbm_to_vmem [thread:$0]  %s728_s0, 256, %s21_s16, [#allocation3], %s592_s3, %s592_s3, %s593_s25  }
  0x24   :  { %s594_s28 = smov [#allocation7]   ;;  %s538_s9 = scalar_lea.hbm %s733_s5, 1024 }
  0x25   :  { %s50_s29 = sshll.u32 %s594_s28, 4  ;;  %p539_p2 = scmp.ne.s32.totalorder %s733_s5, %s538_s9  ;;  %s51_s29 = int_to_ptr.vmem [resolvable:$true] %s50_s29 }
  0x26   :  { %p542_p3 = scmp.lt.u32.totalorder %s538_s9, %s733_s5 }
  0x28   :  { %p544_p4 = pnand %p542_p3, %p539_p2 }
  0x2a   :  { %547 = shalt.err (!%p544_p4)
}
  0x2b   :  { %s548_s17 = scalar_lea.vmem %s51_s29, 1024  ;;  %p553_p6 = scmp.lt.s32.totalorder %s51_s29, %s51_s29 }
  0x2c   :  { %p549_p5 = scmp.ne.s32.totalorder %s51_s29, %s548_s17  ;;  %p554_p7 = scmp.lt.s32.totalorder %s548_s17, %s548_s17 }
  0x2e   :  { %p555_p8 = por %p554_p7, %p553_p6 }
  0x30   :  { %p556_p9 = pnand %p555_p8, %p549_p5 }
  0x32   :  { %559 = shalt.err (!%p556_p9)
}
  0x33   :  { %56 = dma.hbm_to_vmem [thread:$0]  %s733_s5, 1024, %s51_s29, [#allocation6], %s589_s11, %s589_s11, %s590_s12  }
  0x34   :  { %582 = dma.done.wait [#allocation3], 256  }
  0x35   :  { %583 = vsyncadd [#allocation3], 4294967040 }
  0x36   :  { %584 = dma.done.wait [#allocation6], 2048  }
  0x37   :  { %585 = vsyncadd [#allocation6], 4294965248  ;;  %v69_v0 = vld [vmem:[#allocation2] sm:$0xff]  ;;  %v70_v1 = vld [vmem:[#allocation2 + $0x8] sm:$0xff]  ;;  %v595_v3 = vmov 0.0   ;;  %v79_v4 = vlaneseq  ;;  %vm596_vm1 = vmmov 0  }
  0x38   :  { %71 = vadd.xlane.f32.xlu0 %v69_v0  ;;  %v466_v2 = vld [vmem:[#allocation5] sm:$0xff]   ;;  %416 = vmatprep.subr.bf16.mxu0 %v595_v3  ;;  %v467_v16 = vld [vmem:[#allocation5 + $0x8] sm:$0xff]   ;;  %v468_v17 = vld [vmem:[#allocation5 + $0x10] sm:$0xff]   ;;  %s597_s20 = smov [#allocation8]  }
  0x39   :  { %436 = vmatprep.subr.bf16.mxu1 %v595_v3  ;;  %417 = vmatpush3.bf16.msra.mxu0 %v466_v2  ;;  %v80_v5 = vand.u32 127, %v79_v4  ;;  %v469_v18 = vld [vmem:[#allocation5 + $0x18] sm:$0xff]   ;;  %v470_v19 = vld [vmem:[#allocation5 + $0x20] sm:$0xff]   ;;  %v471_v20 = vld [vmem:[#allocation5 + $0x28] sm:$0xff]   ;;  %s363_s21 = sshll.u32 %s597_s20, 4  ;;  %s364_s21 = int_to_ptr.vmem [resolvable:$true] %s363_s21 }
  0x3a   :  { %418 = vmatprep.subr.bf16.mxu0 %v595_v3  ;;  %432 = vmatprep.mubr.msk.bf16.mxu0 %vm596_vm1, %v595_v3  ;;  %v472_v21 = vld [vmem:[#allocation5 + $0x30] sm:$0xff]   ;;  %v473_v22 = vld [vmem:[#allocation5 + $0x38] sm:$0xff]   ;;  %v474_v40 = vld [vmem:[#allocation7] sm:$0xff]   ;;  %s560_s22 = scalar_lea.vmem %s364_s21, 256  ;;  %p565_p11 = scmp.lt.s32.totalorder %s364_s21, %s364_s21 }
  0x3b   :  { %vm81_vm0 = vcmp.lt.s32.totalorder %v80_v5, 24  ;;  %452 = vmatprep.mubr.msk.bf16.mxu1 %vm596_vm1, %v595_v3  ;;  %v376_v31 = vld [vmem:[%s729_s1] ss:$0 sm:$0xff]  ;;  %437 = vmatpush3.bf16.msra.mxu1 %v474_v40  ;;  %v475_v41 = vld [vmem:[#allocation7 + $0x8] sm:$0xff]   ;;  %v477_v43 = vld [vmem:[#allocation7 + $0x18] sm:$0xff]   ;;  %p561_p10 = scmp.ne.s32.totalorder %s364_s21, %s560_s22  ;;  %p566_p12 = scmp.lt.s32.totalorder %s560_s22, %s560_s22 }
  0x3c   :  { %73 = vadd.xlane.f32.xlu0 %v70_v1  ;;  %v377_v35 = vld [vmem:[%s730_s2] ss:$0 sm:$0xff]  ;;  %438 = vmatprep.subr.bf16.mxu1 %v595_v3  ;;  %v478_v44 = vld [vmem:[#allocation7 + $0x20] sm:$0xff]   ;;  %v479_v45 = vld [vmem:[#allocation7 + $0x28] sm:$0xff]  }
  0x3d   :  { %419 = vmatpush3.bf16.msra.mxu0 %v467_v16  ;;  %v476_v42 = vld [vmem:[#allocation7 + $0x10] sm:$0xff]   ;;  %v481_v47 = vld [vmem:[#allocation7 + $0x38] sm:$0xff]   ;;  %p567_p13 = por %p566_p12, %p565_p11 }
  0x3e   :  { %420 = vmatprep.subr.bf16.mxu0 %v595_v3  ;;  %v480_v46 = vld [vmem:[#allocation7 + $0x30] sm:$0xff]  }
  0x3f   :  { %439 = vmatpush3.bf16.msra.mxu1 %v475_v41  ;;  %v378_v48 = vld [vmem:[%s732_s4] ss:$0 sm:$0xff]  ;;  %p568_p0 = pnand %p567_p13, %p561_p10 }
  0x40   :  { %440 = vmatprep.subr.bf16.mxu1 %v595_v3  ;;  %v389_v2 = vld [vmem:[%s734_s6] ss:$0 sm:$0xff] }
  0x41   :  { %421 = vmatpush3.bf16.msra.mxu0 %v468_v17 }
  0x42   :  { %422 = vmatprep.subr.bf16.mxu0 %v595_v3 }
  0x43   :  { %441 = vmatpush3.bf16.msra.mxu1 %v476_v42 }
  0x44   :  { %442 = vmatprep.subr.bf16.mxu1 %v595_v3 }
  0x45   :  { %423 = vmatpush3.bf16.msra.mxu0 %v469_v18 }
  0x46   :  { %424 = vmatprep.subr.bf16.mxu0 %v595_v3 }
  0x47   :  { %443 = vmatpush3.bf16.msra.mxu1 %v477_v43 }
  0x48   :  { %444 = vmatprep.subr.bf16.mxu1 %v595_v3 }
  0x49   :  { %425 = vmatpush3.bf16.msra.mxu0 %v470_v19 }
  0x4a   :  { %426 = vmatprep.subr.bf16.mxu0 %v595_v3 }
  0x4b   :  { %445 = vmatpush3.bf16.msra.mxu1 %v478_v44 }
  0x4c   :  { %446 = vmatprep.subr.bf16.mxu1 %v595_v3 }
  0x4d   :  { %427 = vmatpush3.bf16.msra.mxu0 %v471_v20 }
  0x4e   :  { %428 = vmatprep.subr.bf16.mxu0 %v595_v3 }
  0x4f   :  { %447 = vmatpush3.bf16.msra.mxu1 %v479_v45 }
  0x50   :  { %448 = vmatprep.subr.bf16.mxu1 %v595_v3 }
  0x51   :  { %429 = vmatpush3.bf16.msra.mxu0 %v472_v21 }
  0x52   :  { %430 = vmatprep.subr.bf16.mxu0 %v595_v3 }
  0x53   :  { %449 = vmatpush3.bf16.msra.mxu1 %v480_v46 }
  0x54   :  { %450 = vmatprep.subr.bf16.mxu1 %v595_v3 }
  0x55   :  { %431 = vmatpush3.bf16.msra.mxu0 %v473_v22 }
  0x57   :  { %451 = vmatpush3.bf16.msra.mxu1 %v481_v47 }
  0xc5   :  { %v72_v6 = vpop.xlane.xlu0 %71 }
  0xc6   :  { %v75_v7 = vmul.f32 0.041666668, %v72_v6 }
  0xc8   :  { %v77_v8 = vsub.f32 %v69_v0, %v75_v7 }
  0xc9   :  { %v74_v9 = vpop.xlane.xlu0 %73 }
  0xca   :  { %v76_v10 = vmul.f32 0.041666668, %v74_v9  ;;  %v82_v11 = vsel %vm81_vm0, %v77_v8, 0.0 }
  0xcb   :  { %v84_v12 = vmul.f32 %v82_v11, %v82_v11 }
  0xcc   :  { %v78_v13 = vsub.f32 %v70_v1, %v76_v10 }
  0xcd   :  { %86 = vadd.xlane.f32.xlu1 %v84_v12 }
  0xce   :  { %v83_v14 = vsel %vm81_vm0, %v78_v13, 0.0 }
  0xcf   :  { %v85_v15 = vmul.f32 %v83_v14, %v83_v14 }
  0xd1   :  { %88 = vadd.xlane.f32.xlu1 %v85_v15 }
 0x15a   :  { %v87_v23 = vpop.xlane.xlu1 %86 }
 0x15b   :  { %v90_v24 = vmul.f32 0.041666668, %v87_v23 }
 0x15d   :  { %v92_v25 = vadd.f32 1e-05, %v90_v24 }
 0x15e   :  { %v89_v26 = vpop.xlane.xlu1 %88 }
 0x15f   :  { %482 = vrsqrt.f32 %v92_v25  ;;  %v91_v27 = vmul.f32 0.041666668, %v89_v26 }
 0x161   :  { %v93_v28 = vadd.f32 1e-05, %v91_v27 }
 0x163   :  { %484 = vrsqrt.f32 %v93_v28 }
 0x169   :  { %v483_v29 = vpop.eup %482 }
 0x16a   :  { %v96_v30 = vmul.f32 %v483_v29, %v82_v11 }
 0x16c   :  { %v105_v34 = vmul.f32 %v376_v31, %v96_v30 }
 0x16d   :  { %v485_v32 = vpop.eup %484 }
 0x16e   :  { %v97_v33 = vmul.f32 %v485_v32, %v83_v14  ;;  %v114_v37 = vadd.f32 %v377_v35, %v105_v34 }
 0x170   :  { %v106_v36 = vmul.f32 %v376_v31, %v97_v33 }
 0x172   :  { %v115_v38 = vadd.f32 %v377_v35, %v106_v36 }
 0x174   :  { %v116_v39 = vpack.c.bf16 %v115_v38, %v114_v37 }
 0x176   :  { %433 = vmatmul.mubr.bf16.vlgmr.msra.gmra.mrb[0].mxu0 %v116_v39 }
 0x249   :  { %v222_v49 = vpop.f32.mrb[0].mxu0 }
 0x24a   :  { %v223_v50 = vadd.f32 %v378_v48, %v222_v49  ;;  %v434_v51 = vpop.f32.mrb[1].mxu0 }
 0x24b   :  { %v225_v52 = vpop.f32.mrb[2].mxu0 }
 0x24c   :  { %v387_v53 = vmul.f32 -1.442695, %v223_v50  ;;  %v226_v54 = vadd.f32 %v378_v48, %v225_v52  ;;  %v435_v55 = vpop.f32.mrb[3].mxu0 }
 0x24e   :  { %486 = vpow2.f32 %v387_v53  ;;  %v388_v56 = vmul.f32 -1.442695, %v226_v54 }
 0x250   :  { %488 = vpow2.f32 %v388_v56 }
 0x258   :  { %v487_v57 = vpop.eup %486 }
 0x259   :  { %v235_v58 = vadd.f32 1.0, %v487_v57 }
 0x25a   :  { %v489_v59 = vpop.eup %488 }
 0x25b   :  { %490 = vrcp.f32 %v235_v58  ;;  %v236_v60 = vadd.f32 1.0, %v489_v59 }
 0x25d   :  { %492 = vrcp.f32 %v236_v60 }
 0x265   :  { %v491_v61 = vpop.eup %490 }
 0x266   :  { %v241_v63 = vmul.f32 %v491_v61, %v223_v50 }
 0x267   :  { %v493_v62 = vpop.eup %492 }
 0x268   :  { %v242_v0 = vmul.f32 %v493_v62, %v226_v54 }
 0x26a   :  { %v243_v1 = vpack.c.bf16 %v242_v0, %v241_v63 }
 0x26c   :  { %453 = vmatmul.mubr.bf16.vlgmr.msra.gmra.mrb[0].mxu1 %v243_v1 }
 0x33f   :  { %v349_v3 = vpop.f32.mrb[0].mxu1 }
 0x340   :  { %v350_v4 = vadd.f32 %v389_v2, %v349_v3  ;;  %v454_v5 = vpop.f32.mrb[1].mxu1 }
 0x341   :  { %v352_v6 = vpop.f32.mrb[2].mxu1 }
 0x342   :  { %356 = vst [vmem:[#allocation8] sm:$0xff] %v350_v4  ;;  %v353_v7 = vadd.f32 %v389_v2, %v352_v6  ;;  %v455_v8 = vpop.f32.mrb[3].mxu1 }
 0x344   :  { %357 = vst [vmem:[#allocation8 + $0x8] sm:$0xff] %v353_v7 }
 0x345   :  { %571 = shalt.err (!%p568_p0)
}
 0x346   :  { %s572_s24 = scalar_lea.hbm %s735_s7, 256 }
 0x347   :  { %p573_p1 = scmp.ne.s32.totalorder %s735_s7, %s572_s24  ;;  %p576_p2 = scmp.lt.u32.totalorder %s572_s24, %s735_s7 }
 0x349   :  { %p578_p3 = pnand %p576_p2, %p573_p1 }
 0x34b   :  { %581 = shalt.err (!%p578_p3)
}
 0x34c   :  { %369 = dma.vmem_to_hbm [thread:$0]  %s364_s21, 256, %s735_s7, [#allocation4], %s592_s3, %s592_s3, %s593_s25  }
 0x34d   :  { %586 = dma.done.wait [#allocation4], 256  }
 0x34e   :  { %587 = vsyncadd [#allocation4], 4294967040 }
 0x34f   :  { %373 = vsyncpa [#allocation3], 1 }
 0x350   :  { %374 = vsyncpa [#allocation6], 1 }
 0x351   :  { %375 = vsyncpa [#allocation4], 1 }

</bundles_post_ra>
